<compile_context>
chip_gen: v7x
topology: tpu7x:2x2x1
jax: 0.10.0
libtpu: 0.0.40
codegen_flags: <defaults>
</compile_context>

<pallas_src>
import jax
import jax.numpy as jnp
from jax.experimental import pallas as pl
from jax.experimental.pallas import tpu as pltpu


def policy_kernel(x_ref, w1_ref, b1_ref, w2_ref, b2_ref, w3_ref, b3_ref, o_ref):
    x = x_ref[...]                                          # (TB, 100)

    # --- h1: Linear(100 -> 10) + ReLU (MXU; hidden under the x DMA) ---
    h1 = jnp.dot(x, w1_ref[...], preferred_element_type=jnp.float32)
    h1 = jnp.maximum(h1 + b1_ref[...], 0.0)                 # (TB, 10)

    # --- h2: Linear(10 -> 1) + ReLU (tiny contraction -> broadcast-reduce) ---
    h2 = jnp.sum(h1 * w2_ref[...], axis=1, keepdims=True)   # w2 stored (1, 10)
    h2 = jnp.maximum(h2 + b2_ref[...], 0.0)                 # (TB, 1)

    # --- h3: Linear(1 -> 2) + ReLU (rank-1 outer product via broadcast) ---
    h3 = jnp.maximum(h2 * w3_ref[...] + b3_ref[...], 0.0)   # (TB, 2)

    # --- 2-class softmax via sigmoid identity (VPU + EUP, no XLU reduce) ---
    # p1 = 1 / (1 + exp(h3[:,0] - h3[:,1])) ; p0 = 1 - p1
    d = h3[:, 0:1] - h3[:, 1:2]                             # (TB, 1)
    p1 = 1.0 / (1.0 + jnp.exp(d))                           # exact divide: 1e-5 tol
    p0 = 1.0 - p1
    o_ref[...] = jnp.concatenate([p0, p1], axis=1)          # (TB, 2)


def _round_up(n, m):
    return ((n + m - 1) // m) * m


def _select_tile(B, tb):
    """Pick a batch tile: no near-empty last tile, even grid for v7x megacore."""
    nt = pl.cdiv(B, tb)
    if nt == 1:
        # Single tile: block == full array dims (always layout-legal, any B).
        return B, 1
    if nt % 2:
        nt += 1  # even number of grid steps -> both v7x TCs stay busy
    TB = _round_up(pl.cdiv(B, nt), 8)
    return TB, pl.cdiv(B, TB)


def policy_forward(x, w1, b1, w2, b2, w3, b3, *, tb=16384):
    """x: (B, 100) float32 -> (B, 2) softmax probabilities."""
    B, F = x.shape
    TB, grid = _select_tile(B, tb)

    cost = pl.CostEstimate(
        flops=2 * B * (F * 10 + 10 * 1 + 1 * 2),
        bytes_accessed=B * (F + 2) * 4 + (F * 10 + 10 + 10 + 1 + 2 + 2) * 4,
        transcendentals=B,
    )

    return pl.pallas_call(
        policy_kernel,
        out_shape=jax.ShapeDtypeStruct((B, 2), jnp.float32),
        grid=(grid,),
        in_specs=[
            pl.BlockSpec((TB, F), lambda i: (i, 0)),         # x: tiled over batch
            pl.BlockSpec(w1.shape, lambda i: (0, 0)),        # weights: VMEM-resident
            pl.BlockSpec(b1.shape, lambda i: (0, 0)),
            pl.BlockSpec(w2.shape, lambda i: (0, 0)),
            pl.BlockSpec(b2.shape, lambda i: (0, 0)),
            pl.BlockSpec(w3.shape, lambda i: (0, 0)),
            pl.BlockSpec(b3.shape, lambda i: (0, 0)),
        ],
        out_specs=pl.BlockSpec((TB, 2), lambda i: (i, 0)),   # partial last block OK
        compiler_params=pltpu.CompilerParams(
            dimension_semantics=("parallel",),               # both TCs on v7x
            vmem_limit_bytes=32 * 1024 * 1024,               # v5e default is 16 MiB
        ),
        cost_estimate=cost,
    )(x, w1, b1, w2, b2, w3, b3)


def init_params(key):
    # Deterministic synthetic params (PyTorch nn.Linear shapes).
    k1, k2, k3, k4, k5, k6 = jax.random.split(key, 6)
    # h1: Linear(100, 10) -> stored as (in=100, out=10)
    w1 = jax.random.uniform(k1, (100, 10), jnp.float32, -0.1, 0.1)
    b1 = jax.random.uniform(k2, (1, 10), jnp.float32, -0.1, 0.1)
    # h2: Linear(10, 1) -> stored as (out=1, in=10) for broadcast-reduce
    w2 = jax.random.uniform(k3, (1, 10), jnp.float32, -0.3, 0.3)
    b2 = jax.random.uniform(k4, (1, 1), jnp.float32, -0.3, 0.3)
    # h3: Linear(1, 2) -> stored as (in=1, out=2)
    w3 = jax.random.uniform(k5, (1, 2), jnp.float32, -1.0, 1.0)
    b3 = jax.random.uniform(k6, (1, 2), jnp.float32, -1.0, 1.0)
    return w1, b1, w2, b2, w3, b3


def reference_forward(x, w1, b1, w2, b2, w3, b3):
    h1 = jnp.maximum(x @ w1 + b1, 0.0)
    h2 = jnp.maximum(h1 @ w2.T + b2, 0.0)
    h3 = jnp.maximum(h2 @ w3 + b3, 0.0)
    return jax.nn.softmax(h3, axis=1)


if __name__ == "__main__":
    key = jax.random.PRNGKey(0)
    kx1, kx2, kp = jax.random.split(key, 3)
    params = init_params(kp)

    # Small batch (single full-array tile, matches typical module usage).
    B1 = 8
    x1 = jax.random.normal(kx1, (B1, 100), jnp.float32)
    out1 = jax.block_until_ready(policy_forward(x1, *params))
    ref1 = reference_forward(x1, *params)
    assert out1.shape == (B1, 2)
    assert jnp.allclose(out1, ref1, atol=1e-5, rtol=1e-5), (
        f"max abs err = {jnp.max(jnp.abs(out1 - ref1))}"
    )

    # Multi-tile batch with a ragged tail: exercises the pipelined grid path
    # and Pallas partial-final-block masking (no wrapper-side padding pass).
    B2 = 1030
    x2 = jax.random.normal(kx2, (B2, 100), jnp.float32)
    out2 = jax.block_until_ready(policy_forward(x2, *params, tb=256))
    ref2 = reference_forward(x2, *params)
    assert out2.shape == (B2, 2)
    assert jnp.allclose(out2, ref2, atol=1e-5, rtol=1e-5), (
        f"max abs err = {jnp.max(jnp.abs(out2 - ref2))}"
    )

    print("KERNEL_OK")
</pallas_src>

<mosaic_0001>
module attributes {stable_mosaic.version = 11 : i64} {
  func.func @policy_kernel(%arg0: i32, %arg1: memref<8x100xf32, #tpu.memory_space<vmem>>, %arg2: memref<100x10xf32, #tpu.memory_space<vmem>>, %arg3: memref<1x10xf32, #tpu.memory_space<vmem>>, %arg4: memref<1x10xf32, #tpu.memory_space<vmem>>, %arg5: memref<1x1xf32, #tpu.memory_space<vmem>>, %arg6: memref<1x2xf32, #tpu.memory_space<vmem>>, %arg7: memref<1x2xf32, #tpu.memory_space<vmem>>, %arg8: memref<8x2xf32, #tpu.memory_space<vmem>>) attributes {dimension_semantics = [#tpu.dimension_semantics<parallel>], iteration_bounds = array<i64: 1>, scalar_prefetch = 0 : i64, scratch_operands = 0 : i64, tpu.core_type = #tpu.core_type<tc>, window_params = [{transform_indices = @transform_0, window_bounds = array<i64: 8, 100>}, {pipeline_mode = #tpu.pipeline_mode<synchronous>, transform_indices = @transform_1, window_bounds = array<i64: 100, 10>}, {pipeline_mode = #tpu.pipeline_mode<synchronous>, transform_indices = @transform_2, window_bounds = array<i64: 1, 10>}, {pipeline_mode = #tpu.pipeline_mode<synchronous>, transform_indices = @transform_3, window_bounds = array<i64: 1, 10>}, {pipeline_mode = #tpu.pipeline_mode<synchronous>, transform_indices = @transform_4, window_bounds = array<i64: 1, 1>}, {pipeline_mode = #tpu.pipeline_mode<synchronous>, transform_indices = @transform_5, window_bounds = array<i64: 1, 2>}, {pipeline_mode = #tpu.pipeline_mode<synchronous>, transform_indices = @transform_6, window_bounds = array<i64: 1, 2>}, {transform_indices = @transform_7, window_bounds = array<i64: 8, 2>}]} {
    %c0 = arith.constant 0 : index
    %c0_0 = arith.constant 0 : index
    %0 = vector.load %arg1[%c0, %c0_0] : memref<8x100xf32, #tpu.memory_space<vmem>>, vector<8x100xf32>
    %c0_1 = arith.constant 0 : index
    %c0_2 = arith.constant 0 : index
    %1 = vector.load %arg2[%c0_1, %c0_2] : memref<100x10xf32, #tpu.memory_space<vmem>>, vector<100x10xf32>
    %cst = arith.constant dense<0.000000e+00> : vector<8x10xf32>
    %2 = tpu.matmul %0, %1, %cst {dimension_numbers = #tpu.dot_dimension_numbers<[1], [0], [0], [1], [0, 0, 1, 1], [], []>} : vector<8x100xf32>, vector<100x10xf32>, vector<8x10xf32> -> vector<8x10xf32>
    %c0_3 = arith.constant 0 : index
    %c0_4 = arith.constant 0 : index
    %3 = vector.load %arg3[%c0_3, %c0_4] : memref<1x10xf32, #tpu.memory_space<vmem>>, vector<1x10xf32>
    %4 = vector.broadcast %3 : vector<1x10xf32> to vector<8x10xf32>
    %5 = arith.addf %2, %4 : vector<8x10xf32>
    %cst_5 = arith.constant 0.000000e+00 : f32
    %6 = vector.broadcast %cst_5 : f32 to vector<8x10xf32>
    %7 = arith.maximumf %5, %6 : vector<8x10xf32>
    %c0_6 = arith.constant 0 : index
    %c0_7 = arith.constant 0 : index
    %8 = vector.load %arg4[%c0_6, %c0_7] : memref<1x10xf32, #tpu.memory_space<vmem>>, vector<1x10xf32>
    %9 = vector.broadcast %8 : vector<1x10xf32> to vector<8x10xf32>
    %10 = arith.mulf %7, %9 : vector<8x10xf32>
    %cst_8 = arith.constant dense<0.000000e+00> : vector<8xf32>
    %11 = vector.multi_reduction <add>, %10, %cst_8 [1] : vector<8x10xf32> to vector<8xf32>
    %12 = vector.shape_cast %11 : vector<8xf32> to vector<8x1xf32>
    %c0_9 = arith.constant 0 : index
    %c0_10 = arith.constant 0 : index
    %13 = vector.load %arg5[%c0_9, %c0_10] : memref<1x1xf32, #tpu.memory_space<vmem>>, vector<1x1xf32>
    %14 = vector.broadcast %13 : vector<1x1xf32> to vector<8x1xf32>
    %15 = arith.addf %12, %14 : vector<8x1xf32>
    %cst_11 = arith.constant 0.000000e+00 : f32
    %16 = vector.broadcast %cst_11 : f32 to vector<8x1xf32>
    %17 = arith.maximumf %15, %16 : vector<8x1xf32>
    %c0_12 = arith.constant 0 : index
    %c0_13 = arith.constant 0 : index
    %18 = vector.load %arg6[%c0_12, %c0_13] : memref<1x2xf32, #tpu.memory_space<vmem>>, vector<1x2xf32>
    %19 = vector.broadcast %17 : vector<8x1xf32> to vector<8x2xf32>
    %20 = vector.broadcast %18 : vector<1x2xf32> to vector<8x2xf32>
    %21 = arith.mulf %19, %20 : vector<8x2xf32>
    %c0_14 = arith.constant 0 : index
    %c0_15 = arith.constant 0 : index
    %22 = vector.load %arg7[%c0_14, %c0_15] : memref<1x2xf32, #tpu.memory_space<vmem>>, vector<1x2xf32>
    %23 = vector.broadcast %22 : vector<1x2xf32> to vector<8x2xf32>
    %24 = arith.addf %21, %23 : vector<8x2xf32>
    %cst_16 = arith.constant 0.000000e+00 : f32
    %25 = vector.broadcast %cst_16 : f32 to vector<8x2xf32>
    %26 = arith.maximumf %24, %25 : vector<8x2xf32>
    %27 = vector.extract_strided_slice %26 {offsets = [0, 0], sizes = [8, 1], strides = [1, 1]} : vector<8x2xf32> to vector<8x1xf32>
    %28 = vector.extract_strided_slice %26 {offsets = [0, 1], sizes = [8, 1], strides = [1, 1]} : vector<8x2xf32> to vector<8x1xf32>
    %29 = arith.subf %27, %28 : vector<8x1xf32>
    %30 = math.exp %29 : vector<8x1xf32>
    %cst_17 = arith.constant 1.000000e+00 : f32
    %31 = vector.broadcast %cst_17 : f32 to vector<8x1xf32>
    %32 = arith.addf %31, %30 : vector<8x1xf32>
    %cst_18 = arith.constant 1.000000e+00 : f32
    %33 = vector.broadcast %cst_18 : f32 to vector<8x1xf32>
    %34 = arith.divf %33, %32 : vector<8x1xf32>
    %cst_19 = arith.constant 1.000000e+00 : f32
    %35 = vector.broadcast %cst_19 : f32 to vector<8x1xf32>
    %36 = arith.subf %35, %34 : vector<8x1xf32>
    %37 = tpu.concatenate %36, %34 in 1 : vector<8x1xf32>, vector<8x1xf32> -> vector<8x2xf32>
    %c0_20 = arith.constant 0 : index
    %c0_21 = arith.constant 0 : index
    %38 = vector.load %arg8[%c0_20, %c0_21] : memref<8x2xf32, #tpu.memory_space<vmem>>, vector<8x2xf32>
    tpu.vector_store %arg8[%c0_20, %c0_21], %37 {strides = array<i32>} : memref<8x2xf32, #tpu.memory_space<vmem>>, vector<8x2xf32>,
    return
  }
  func.func @transform_0(%arg0: i32) -> (i32, i32) {
    %c0_i32 = arith.constant 0 : i32
    %c0_i32_0 = arith.constant 0 : i32
    return %arg0, %c0_i32 : i32, i32
  }
  func.func @transform_1(%arg0: i32) -> (i32, i32) {
    %c0_i32 = arith.constant 0 : i32
    %c0_i32_0 = arith.constant 0 : i32
    %c0_i32_1 = arith.constant 0 : i32
    return %c0_i32, %c0_i32_0 : i32, i32
  }
  func.func @transform_2(%arg0: i32) -> (i32, i32) {
    %c0_i32 = arith.constant 0 : i32
    %c0_i32_0 = arith.constant 0 : i32
    %c0_i32_1 = arith.constant 0 : i32
    return %c0_i32, %c0_i32_0 : i32, i32
  }
  func.func @transform_3(%arg0: i32) -> (i32, i32) {
    %c0_i32 = arith.constant 0 : i32
    %c0_i32_0 = arith.constant 0 : i32
    %c0_i32_1 = arith.constant 0 : i32
    return %c0_i32, %c0_i32_0 : i32, i32
  }
  func.func @transform_4(%arg0: i32) -> (i32, i32) {
    %c0_i32 = arith.constant 0 : i32
    %c0_i32_0 = arith.constant 0 : i32
    %c0_i32_1 = arith.constant 0 : i32
    return %c0_i32, %c0_i32_0 : i32, i32
  }
  func.func @transform_5(%arg0: i32) -> (i32, i32) {
    %c0_i32 = arith.constant 0 : i32
    %c0_i32_0 = arith.constant 0 : i32
    %c0_i32_1 = arith.constant 0 : i32
    return %c0_i32, %c0_i32_0 : i32, i32
  }
  func.func @transform_6(%arg0: i32) -> (i32, i32) {
    %c0_i32 = arith.constant 0 : i32
    %c0_i32_0 = arith.constant 0 : i32
    %c0_i32_1 = arith.constant 0 : i32
    return %c0_i32, %c0_i32_0 : i32, i32
  }
  func.func @transform_7(%arg0: i32) -> (i32, i32) {
    %c0_i32 = arith.constant 0 : i32
    %c0_i32_0 = arith.constant 0 : i32
    return %arg0, %c0_i32 : i32, i32
  }
}

</mosaic_0001>

<bundles_post_ra>
// kernel: tpu_custom_call.1
= control target key start
LH: loop header
LB: loop body
LE: loop exit
PB: predicated region body
PF: predicated region fallthrough
CT: control target
= control target key end

     0   :  { %v273_v0 = vmov 0.0|0.0   ;;  %vm274_vm0 = vmmov 0   ;;  %v275_v4 = vmov 0.0   ;;  %vm53_vm1 = vcmask 1043456   ;;  %s278_s12 = smov 1   ;;  %s379_s1 = inlined_call_operand.vmem [shape: f32[100,10], index: 1, kind: input, shape index: {}]   ;;  %s380_s0 = inlined_call_operand.vmem [shape: f32[8,100], index: 0, kind: input, shape index: {}]   ;;  %s381_s4 = inlined_call_operand.<no memory space> [shape: f32[1,1], index: 4, kind: input, shape index: {}]   ;;  %s382_s2 = inlined_call_operand.vmem [shape: f32[1,10], index: 2, kind: input, shape index: {}]   ;;  %s383_s3 = inlined_call_operand.vmem [shape: f32[1,10], index: 3, kind: input, shape index: {}]   ;;  %s384_s5 = inlined_call_operand.vmem [shape: f32[1,2], index: 5, kind: input, shape index: {}]   ;;  %s385_s6 = inlined_call_operand.vmem [shape: f32[1,2], index: 6, kind: input, shape index: {}]   ;;  %s386_s7 = inlined_call_operand.vmem [shape: f32[8,2], index: 7, kind: output, shape index: {}]  }
   0x1   :  { %244 = vmatprep.subr.bf16.mxu0 %v273_v0  ;;  %v29_v1 = vld [vmem:[%s379_s1] sm:$0xff]  ;;  %v30_v2 = vld [vmem:[%s379_s1 + $0x8] sm:$0xff]  ;;  %v31_v3 = vld [vmem:[%s379_s1 + $0x10] sm:$0xff]  ;;  %241 = vmatprep.mubr.msk.f32.mxu0 %vm274_vm0, %v275_v4  ;;  %vm49_vm2 = vcmask 818176   ;;  %v12_v22 = vstv %s381_s4  ;;  %vm136_vm3 = vcmask 80896   ;;  %v276_v31 = vmov 0  }
   0x2   :  { %v245_v5 = vpack.c.bf16 %v30_v2, %v29_v1  ;;  %v32_v6 = vld [vmem:[%s379_s1 + $0x18] sm:$0xff]  ;;  %v33_v8 = vld [vmem:[%s379_s1 + $0x20] sm:$0xff]  ;;  %v34_v9 = vld [vmem:[%s379_s1 + $0x28] sm:$0xff]  ;;  %13 = vst [vmem:[#allocation2] sm:$0x1] %v12_v22  ;;  %268 = vset.pattern.permute.xlu0 %v276_v31  ;;  %vm186_vm4 = vcmask 7168  }
   0x3   :  { %v248_v7 = vpack.c.bf16 %v32_v6, %v31_v3  ;;  %v251_v10 = vpack.c.bf16 %v34_v9, %v33_v8  ;;  %v35_v11 = vld [vmem:[%s379_s1 + $0x30] sm:$0xff]  ;;  %v36_v12 = vld [vmem:[%s379_s1 + $0x38] sm:$0xff]  ;;  %v37_v14 = vld [vmem:[%s379_s1 + $0x40] sm:$0xff]  ;;  %vm188_vm5 = vcmask 15360  }
   0x4   :  { %246 = vmatpush3.bf16.msra.mxu0 %v245_v5  ;;  %v254_v13 = vpack.c.bf16 %v36_v12, %v35_v11  ;;  %v38_v15 = vld [vmem:[%s379_s1 + $0x48] sm:$0xff]  ;;  %v39_v17 = vld [vmem:[%s379_s1 + $0x50] sm:$0xff]  ;;  %v40_v18 = vld [vmem:[%s379_s1 + $0x58] sm:$0xff] }
   0x5   :  { %247 = vmatprep.subr.bf16.mxu0 %v273_v0  ;;  %v257_v16 = vpack.c.bf16 %v38_v15, %v37_v14  ;;  %v260_v19 = vpack.c.bf16 %v40_v18, %v39_v17  ;;  %v41_v20 = vld [vmem:[%s379_s1 + $0x60] sm:$0xf] }
   0x6   :  { %v28_v21 = vld [vmem:[%s380_s0] sm:$0xff] }
   0x7   :  { %v194_v23 = vld [vmem:[%s382_s2] ss:$0 sm:$0xff] }
   0x8   :  { %249 = vmatpush3.bf16.msra.mxu0 %v248_v7  ;;  %v197_v27 = vld [vmem:[%s383_s3] ss:$0 sm:$0xff]  ;;  %s277_s3 = smov 127  }
   0x9   :  { %250 = vmatprep.subr.bf16.mxu0 %v273_v0  ;;  %v198_v32 = vld [vmem:[#allocation2] ss:$0 sm:$0xff] }
   0xa   :  { %v199_v36 = vld [vmem:[%s384_s5] ss:$0 sm:$0xff] }
   0xb   :  { %v200_v38 = vld [vmem:[%s385_s6] ss:$0 sm:$0xff] }
   0xc   :  { %252 = vmatpush3.bf16.msra.mxu0 %v251_v10 }
   0xd   :  { %253 = vmatprep.subr.bf16.mxu0 %v273_v0 }
  0x10   :  { %255 = vmatpush3.bf16.msra.mxu0 %v254_v13 }
  0x11   :  { %256 = vmatprep.subr.bf16.mxu0 %v273_v0 }
  0x14   :  { %258 = vmatpush3.bf16.msra.mxu0 %v257_v16 }
  0x15   :  { %259 = vmatprep.subr.bf16.mxu0 %v273_v0 }
  0x18   :  { %261 = vmatpush3.bf16.msra.mxu0 %v260_v19 }
  0x19   :  { %239 = vmatprep.subr.mxu0 %v275_v4 }
  0x1c   :  { %240 = vmatpush3.msk.msra.mxu0 %vm53_vm1, %v41_v20 }
  0x1d   :  { %242 = vmatmul.mubr.msk.f32.vlgmr.msra.gmra.mrb[0].mxu0 %vm49_vm2, %v28_v21 }
  0xf0   :  { %v123_v24 = vpop.f32.mrb[0].mxu0 }
  0xf1   :  { %v124_v25 = vadd.f32 %v194_v23, %v123_v24  ;;  %v243_v26 = vpop.f32.mrb[1].mxu0 }
  0xf3   :  { %v127_v28 = vmax.f32 %v124_v25, 0.0 }
  0xf5   :  { %v135_v29 = vmul.f32 %v197_v27, %v127_v28 }
  0xf7   :  { %v137_v30 = vsel %vm136_vm3, %v135_v29, 0.0 }
  0xf8   :  { %138 = vadd.xlane.f32.xlu0 %v137_v30 }
 0x185   :  { %v139_v33 = vpop.xlane.xlu0 %138 }
 0x186   :  { %v147_v34 = vadd.f32 %v198_v32, %v139_v33 }
 0x188   :  { %v148_v35 = vmax.f32 %v147_v34, 0.0 }
 0x18a   :  { %152 = vperm.xlu0 %268, %v148_v35  }
 0x209   :  { %v153_v37 = vpop.permute.xlu0 %152 }
 0x20a   :  { %v161_v39 = vmul.f32 %v199_v36, %v153_v37 }
 0x20c   :  { %v169_v40 = vadd.f32 %v200_v38, %v161_v39 }
 0x20e   :  { %v170_v41 = vmax.f32 %v169_v40, 0.0 }
 0x210   :  { %172 = vrot.lane.b32.xlu1 %v170_v41, %s277_s3 }
 0x282   :  { %v173_v42 = vpop.permute.xlu1 %172 }
 0x283   :  { %v175_v43 = vsub.f32 %v170_v41, %v173_v42 }
 0x285   :  { %v176_v44 = vmul.f32 1.442695, %v175_v43 }
 0x287   :  { %269 = vpow2.f32 %v176_v44 }
 0x291   :  { %v270_v45 = vpop.eup %269 }
 0x292   :  { %v178_v46 = vadd.f32 1.0, %v270_v45 }
 0x294   :  { %271 = vrcp.f32 %v178_v46 }
 0x29e   :  { %v272_v47 = vpop.eup %271 }
 0x29f   :  { %183 = vrot.lane.b32.xlu1 %v272_v47, %s278_s12  ;;  %v181_v48 = vsub.f32 1.0, %v272_v47 }
 0x311   :  { %v184_v49 = vpop.permute.xlu1 %183 }
 0x312   :  { %v187_v50 = vsel %vm186_vm4, %v181_v48, %v184_v49 }
 0x313   :  { %189 = vst.msk [vmem:[%s386_s7] sm:$0xff] %vm188_vm5, %v187_v50 }

</bundles_post_ra>
